<compile_context>
chip_gen: v6e
topology: v6e:2x2x1
jax: 0.10.0
libtpu: 0.0.40
codegen_flags: <defaults>
</compile_context>

<pallas_src>
import functools

import jax
import jax.numpy as jnp
import numpy as np
from jax.experimental import pallas as pl
from jax.experimental.pallas import tpu as pltpu


# ---------------------------------------------------------------------------
# Pallas kernel: whole HierarchicalVAE forward for a tile of rows.
# ---------------------------------------------------------------------------
def _hvae_kernel(feats_ref, pi_ref, eps_v_ref, eps_g_ref,
                 w1_ref, b1_ref, wh_ref, bh_ref,
                 out_ref, *, num_components, latent_size, out_width,
                 total_rows, needs_mask):
  K = num_components
  L = latent_size
  KL = K * L

  x = feats_ref[...]                                   # [TN, D_in] f32
  tn = x.shape[0]
  pi = pi_ref[...]                                     # [TN, 2]    f32
  eps_v = eps_v_ref[...]                               # [TN, L]    f32
  eps_g = eps_g_ref[...]                               # [TN, KL]   f32

  if needs_mask:
    # Ragged last tile: zero invalid rows BEFORE matmuls / exponentials so no
    # inf/nan is ever produced (their output rows are discarded by Pallas).
    row_start = pl.program_id(0) * tn
    row_ids = jax.lax.broadcasted_iota(jnp.int32, (tn, 1), 0)
    live = row_ids < (total_rows - row_start)
    x = jnp.where(live, x, 0.0)
    pi = jnp.where(live, pi, 0.0)
    eps_v = jnp.where(live, eps_v, 0.0)
    eps_g = jnp.where(live, eps_g, 0.0)

  # Fused trunk: columns 0:H are the vanilla hidden, H:2H the GMM hidden.
  # Activations cast in-VMEM to the weight dtype (bf16 fast / f32 accurate);
  # accumulation is always f32.
  cdt = w1_ref.dtype
  h_cat = jnp.tanh(
      jnp.dot(x.astype(cdt), w1_ref[...], preferred_element_type=jnp.float32)
      + b1_ref[...])                                   # [TN, 2H] f32

  # Fused heads: block-diagonal weight routes each branch's hidden to its heads.
  # Column layout: [v_mean(L) | v_logvar(L) | g_means(KL) | g_logvars(KL) | g_logits(K)]
  heads = jnp.dot(h_cat.astype(wh_ref.dtype), wh_ref[...],
                  preferred_element_type=jnp.float32) + bh_ref[...]
  v_mean = heads[:, 0:L]
  v_lv = heads[:, L:2 * L]
  means_all = heads[:, 2 * L:2 * L + KL]
  lvs_all = heads[:, 2 * L + KL:2 * L + 2 * KL]
  logits = heads[:, 2 * L + 2 * KL:2 * L + 2 * KL + K]

  # ----- Vanilla VAE branch (exp reuse: exp(lv) = exp(0.5*lv)^2) -------------
  e_half_v = jnp.exp(0.5 * v_lv)
  v_h = v_mean + e_half_v * eps_v
  v_kld = -0.5 * (1.0 + v_lv - v_mean * v_mean - e_half_v * e_half_v)

  # ----- GMM branch -----------------------------------------------------------
  lmax = jnp.max(logits, axis=-1, keepdims=True)
  ew = jnp.exp(logits - lmax)
  gmm_w = ew / jnp.sum(ew, axis=-1, keepdims=True)     # exact softmax

  e_half_g = jnp.exp(0.5 * lvs_all)
  h_all = means_all + e_half_g * eps_g
  kld_all = -0.5 * (1.0 + lvs_all - means_all * means_all - e_half_g * e_half_g)

  # apply_weight over K components, with the pi combine folded in:
  # accumulators start at pi0 * vanilla branch; gmm_w is pre-scaled by pi1.
  p0 = jnp.broadcast_to(pi[:, 0:1], (tn, L))
  mean = p0 * v_mean
  log_var = p0 * v_lv
  h = p0 * v_h
  kld = p0 * v_kld
  w_scaled = gmm_w * pi[:, 1:2]                        # [TN, K]
  for k in range(K):
    wk = jnp.broadcast_to(w_scaled[:, k:k + 1], (tn, L))
    sl = slice(k * L, (k + 1) * L)
    mean = mean + wk * means_all[:, sl]
    log_var = log_var + wk * lvs_all[:, sl]
    h = h + wk * h_all[:, sl]
    kld = kld + wk * kld_all[:, sl]

  # Direct lane-sliced stores into the lane-dense output slab (no concat temp):
  # [gmm_w(K) | mean(L) | log_var(L) | sampled_h(L) | kld(L) | zero pad]
  odt = out_ref.dtype
  out_ref[:, 0:K] = gmm_w.astype(odt)
  out_ref[:, K:K + L] = mean.astype(odt)
  out_ref[:, K + L:K + 2 * L] = log_var.astype(odt)
  out_ref[:, K + 2 * L:K + 3 * L] = h.astype(odt)
  out_ref[:, K + 3 * L:K + 4 * L] = kld.astype(odt)
  used = K + 4 * L
  if out_width > used:
    out_ref[:, used:out_width] = jnp.zeros((tn, out_width - used), odt)


def _round_up(a, m):
  return ((a + m - 1) // m) * m


# ---------------------------------------------------------------------------
# Wrapper
# ---------------------------------------------------------------------------
def hierarchical_vae_forward(feats, pi, eps_v, eps_g, params,
                             *, num_components, latent_size,
                             row_tile=1024, high_precision=False):
  """feats: [B, T, D_in], pi: [B, T, 2], eps_v: [B, T, L], eps_g: [B, T, K*L]."""
  B, T, D_in = feats.shape
  K, L = num_components, latent_size
  KL = K * L
  N = B * T
  H = params['vW1'].shape[1]

  cdt = jnp.float32 if high_precision else jnp.bfloat16   # matmul operand dtype
  odt = jnp.float32 if high_precision else jnp.bfloat16   # packed output dtype

  # --- fuse weights on the host side (tiny; done once) ----------------------
  # Trunk: x @ [vW1 | gW1]; f32 accumulation happens in-kernel.
  w1_cat = jnp.concatenate([params['vW1'], params['gW1']], axis=1).astype(cdt)
  b1_cat = jnp.concatenate([params['vb1'], params['gb1']],
                           axis=1).astype(jnp.float32)              # [1, 2H]
  # Heads: block-diagonal so the vanilla hidden only feeds vanilla heads and
  # the GMM hidden only feeds GMM heads.
  HC = 2 * L + 2 * KL + K
  wh = jnp.zeros((2 * H, HC), jnp.float32)
  wh = wh.at[:H, 0:L].set(params['vWm'])
  wh = wh.at[:H, L:2 * L].set(params['vWv'])
  wh = wh.at[H:, 2 * L:2 * L + KL].set(params['gWm'])
  wh = wh.at[H:, 2 * L + KL:2 * L + 2 * KL].set(params['gWv'])
  wh = wh.at[H:, 2 * L + 2 * KL:].set(params['gWw'])
  wh = wh.astype(cdt)
  bh = jnp.concatenate([params['vbm'], params['vbv'], params['gbm'],
                        params['gbv'], params['gbw']],
                       axis=1).astype(jnp.float32)                  # [1, HC]

  # --- row tiling: big tiles (amortize ~0.35us/step), >=2 grid steps for the
  # two v7x TensorCores, multiple of 8 for the (8,128) constraint. No padding
  # copies: the ragged last tile is masked in-kernel.
  rt = min(row_tile, _round_up(pl.cdiv(N, 2), 8))
  rt = max(rt, 8)
  n_tiles = pl.cdiv(N, rt)
  needs_mask = (n_tiles * rt != N)

  # Flatten rows (contiguous reshape; no extra HBM pass, no dtype cast pass).
  feats2 = feats.reshape(N, D_in)
  pi2 = pi.reshape(N, 2)
  eps_v2 = eps_v.reshape(N, L)
  eps_g2 = eps_g.reshape(N, KL)

  out_width = max(128, _round_up(K + 4 * L, 128))

  row_spec = lambda cols: pl.BlockSpec((rt, cols), lambda i: (i, 0))
  full_spec = lambda shp: pl.BlockSpec(shp, lambda i: (0, 0))

  kernel = functools.partial(
      _hvae_kernel, num_components=K, latent_size=L, out_width=out_width,
      total_rows=N, needs_mask=needs_mask)

  packed = pl.pallas_call(
      kernel,
      grid=(n_tiles,),
      in_specs=[
          row_spec(D_in), row_spec(2), row_spec(L), row_spec(KL),
          full_spec((D_in, 2 * H)), full_spec((1, 2 * H)),
          full_spec((2 * H, HC)), full_spec((1, HC)),
      ],
      out_specs=pl.BlockSpec((rt, out_width), lambda i: (i, 0)),
      out_shape=jax.ShapeDtypeStruct((N, out_width), odt),
      compiler_params=pltpu.CompilerParams(
          dimension_semantics=("parallel",),
          vmem_limit_bytes=32 * 1024 * 1024),
  )(feats2, pi2, eps_v2, eps_g2, w1_cat, b1_cat, wh, bh)

  gmm_w = packed[:, 0:K]
  mean = packed[:, K:K + L]
  log_var = packed[:, K + L:K + 2 * L]
  h = packed[:, K + 2 * L:K + 3 * L]
  kld = packed[:, K + 3 * L:K + 4 * L]

  return {
      'gmm_weight': gmm_w.reshape(B, T, K),
      'mean': mean.reshape(B, T, L),
      'log_var': log_var.reshape(B, T, L),
      'sampled_h': h.reshape(B, T, L),
      'losses': {'vae_kld_loss': kld.reshape(B, T, L)},
  }


# ---------------------------------------------------------------------------
# Pure-JAX reference (mirrors the PyTorch semantics) for validation.
# ---------------------------------------------------------------------------
def _reference(feats, pi, eps_v, eps_g, p, K, L):
  hi = jax.lax.Precision.HIGHEST
  B, T, _ = feats.shape
  x = feats.reshape(B * T, -1)
  pi2 = pi.reshape(B * T, 2)
  ev = eps_v.reshape(B * T, L)
  eg = eps_g.reshape(B * T, K * L)

  vh = jnp.tanh(jnp.dot(x, p['vW1'], precision=hi) + p['vb1'])
  v_mean = jnp.dot(vh, p['vWm'], precision=hi) + p['vbm']
  v_lv = jnp.dot(vh, p['vWv'], precision=hi) + p['vbv']
  v_h = v_mean + jnp.exp(0.5 * v_lv) * ev
  v_kld = -0.5 * (1.0 + v_lv - v_mean ** 2 - jnp.exp(v_lv))

  gh = jnp.tanh(jnp.dot(x, p['gW1'], precision=hi) + p['gb1'])
  w = jax.nn.softmax(jnp.dot(gh, p['gWw'], precision=hi) + p['gbw'], axis=-1)
  gm = (jnp.dot(gh, p['gWm'], precision=hi) + p['gbm']).reshape(-1, K, L)
  gl = (jnp.dot(gh, p['gWv'], precision=hi) + p['gbv']).reshape(-1, K, L)
  ge = eg.reshape(-1, K, L)
  ghs = gm + jnp.exp(0.5 * gl) * ge
  gk = -0.5 * (1.0 + gl - gm ** 2 - jnp.exp(gl))
  aw = lambda t: jnp.sum(t * w[:, :, None], axis=1)
  g_mean, g_lv, g_h, g_kld = aw(gm), aw(gl), aw(ghs), aw(gk)

  comb = lambda a, b: pi2[:, 0:1] * a + pi2[:, 1:2] * b
  return {
      'gmm_weight': w.reshape(B, T, K),
      'mean': comb(v_mean, g_mean).reshape(B, T, L),
      'log_var': comb(v_lv, g_lv).reshape(B, T, L),
      'sampled_h': comb(v_h, g_h).reshape(B, T, L),
      'losses': {'vae_kld_loss': comb(v_kld, g_kld).reshape(B, T, L)},
  }


def _np_f32(x):
  return np.asarray(jnp.asarray(x, jnp.float32))


def _check(out, ref, rtol, atol):
  pairs = [
      (out['gmm_weight'], ref['gmm_weight']),
      (out['mean'], ref['mean']),
      (out['log_var'], ref['log_var']),
      (out['sampled_h'], ref['sampled_h']),
      (out['losses']['vae_kld_loss'], ref['losses']['vae_kld_loss']),
  ]
  for a, b in pairs:
    np.testing.assert_allclose(_np_f32(a), _np_f32(b), rtol=rtol, atol=atol)


if __name__ == "__main__":
  D_in, H = 32, 32            # fc_sizes = [32, 32]
  L = 16                      # latent_size
  K = 4                       # num_components

  key = jax.random.PRNGKey(0)
  ks = jax.random.split(key, 16)

  def w(k, shape, scale=0.1):
    return (scale * jax.random.normal(k, shape)).astype(jnp.float32)

  params = {
      'vW1': w(ks[0], (D_in, H)), 'vb1': w(ks[1], (1, H)),
      'vWm': w(ks[2], (H, L)),    'vbm': w(ks[3], (1, L)),
      'vWv': w(ks[4], (H, L)),    'vbv': w(ks[5], (1, L)),
      'gW1': w(ks[6], (D_in, H)), 'gb1': w(ks[7], (1, H)),
      'gWm': w(ks[8], (H, K * L)), 'gbm': w(ks[9], (1, K * L)),
      'gWv': w(ks[10], (H, K * L)), 'gbv': w(ks[11], (1, K * L)),
      'gWw': w(ks[12], (H, K)),   'gbw': w(ks[13], (1, K)),
  }

  def run_case(B, T, seed, high_precision, tol):
    kk = jax.random.split(jax.random.PRNGKey(seed), 4)
    feats = jax.random.normal(kk[0], (B, T, D_in), dtype=jnp.float32)
    pi = jax.nn.softmax(jax.random.normal(kk[1], (B, T, 2), dtype=jnp.float32),
                        axis=-1)
    # Deterministic reparameterization noise (stands in for torch.randn).
    eps_v = jax.random.normal(kk[2], (B, T, L), dtype=jnp.float32)
    eps_g = jax.random.normal(kk[3], (B, T, K * L), dtype=jnp.float32)
    out = hierarchical_vae_forward(
        feats, pi, eps_v, eps_g, params,
        num_components=K, latent_size=L, high_precision=high_precision)
    jax.block_until_ready(out)
    ref = _reference(feats, pi, eps_v, eps_g, params, K, L)
    _check(out, ref, rtol=tol, atol=tol)

  # Small case (tiny tiles, grid = 2 steps).
  run_case(B=2, T=8, seed=7, high_precision=False, tol=2e-2)
  # Larger case (1024-row tiles, grid = 2 steps, both branches exercised).
  run_case(B=2, T=1024, seed=11, high_precision=False, tol=2e-2)
  # Ragged case: N = 1000, tile = 504 -> masked last tile (no pad copies).
  run_case(B=4, T=250, seed=13, high_precision=False, tol=2e-2)
  # Full-f32 validation path at tight tolerance (correctness-review request).
  run_case(B=2, T=1024, seed=11, high_precision=True, tol=1e-3)

  print("KERNEL_OK")
</pallas_src>

<mosaic_0001>
module attributes {stable_mosaic.version = 11 : i64} {
  func.func @_hvae_kernel(%arg0: i32, %arg1: memref<8x32xf32, #tpu.memory_space<vmem>>, %arg2: memref<8x2xf32, #tpu.memory_space<vmem>>, %arg3: memref<8x16xf32, #tpu.memory_space<vmem>>, %arg4: memref<8x64xf32, #tpu.memory_space<vmem>>, %arg5: memref<32x64xbf16, #tpu.memory_space<vmem>>, %arg6: memref<1x64xf32, #tpu.memory_space<vmem>>, %arg7: memref<64x164xbf16, #tpu.memory_space<vmem>>, %arg8: memref<1x164xf32, #tpu.memory_space<vmem>>, %arg9: memref<8x128xbf16, #tpu.memory_space<vmem>>) attributes {dimension_semantics = [#tpu.dimension_semantics<parallel>], iteration_bounds = array<i64: 2>, scalar_prefetch = 0 : i64, scratch_operands = 0 : i64, tpu.core_type = #tpu.core_type<tc>, window_params = [{transform_indices = @transform_0, window_bounds = array<i64: 8, 32>}, {transform_indices = @transform_1, window_bounds = array<i64: 8, 2>}, {transform_indices = @transform_2, window_bounds = array<i64: 8, 16>}, {transform_indices = @transform_3, window_bounds = array<i64: 8, 64>}, {pipeline_mode = #tpu.pipeline_mode<synchronous>, transform_indices = @transform_4, window_bounds = array<i64: 32, 64>}, {pipeline_mode = #tpu.pipeline_mode<synchronous>, transform_indices = @transform_5, window_bounds = array<i64: 1, 64>}, {pipeline_mode = #tpu.pipeline_mode<synchronous>, transform_indices = @transform_6, window_bounds = array<i64: 64, 164>}, {pipeline_mode = #tpu.pipeline_mode<synchronous>, transform_indices = @transform_7, window_bounds = array<i64: 1, 164>}, {transform_indices = @transform_8, window_bounds = array<i64: 8, 128>}]} {
    %c0 = arith.constant 0 : index
    %c0_0 = arith.constant 0 : index
    %0 = vector.load %arg1[%c0, %c0_0] : memref<8x32xf32, #tpu.memory_space<vmem>>, vector<8x32xf32>
    %c0_1 = arith.constant 0 : index
    %c0_2 = arith.constant 0 : index
    %1 = vector.load %arg2[%c0_1, %c0_2] : memref<8x2xf32, #tpu.memory_space<vmem>>, vector<8x2xf32>
    %c0_3 = arith.constant 0 : index
    %c0_4 = arith.constant 0 : index
    %2 = vector.load %arg3[%c0_3, %c0_4] : memref<8x16xf32, #tpu.memory_space<vmem>>, vector<8x16xf32>
    %c0_5 = arith.constant 0 : index
    %c0_6 = arith.constant 0 : index
    %3 = vector.load %arg4[%c0_5, %c0_6] : memref<8x64xf32, #tpu.memory_space<vmem>>, vector<8x64xf32>
    %4 = arith.truncf %0 : vector<8x32xf32> to vector<8x32xbf16>
    %c0_7 = arith.constant 0 : index
    %c0_8 = arith.constant 0 : index
    %5 = vector.load %arg5[%c0_7, %c0_8] : memref<32x64xbf16, #tpu.memory_space<vmem>>, vector<32x64xbf16>
    %cst = arith.constant dense<0.000000e+00> : vector<8x64xf32>
    %6 = tpu.matmul %4, %5, %cst {dimension_numbers = #tpu.dot_dimension_numbers<[1], [0], [0], [1], [0, 0, 1, 1], [], []>} : vector<8x32xbf16>, vector<32x64xbf16>, vector<8x64xf32> -> vector<8x64xf32>
    %c0_9 = arith.constant 0 : index
    %c0_10 = arith.constant 0 : index
    %7 = vector.load %arg6[%c0_9, %c0_10] : memref<1x64xf32, #tpu.memory_space<vmem>>, vector<1x64xf32>
    %8 = vector.broadcast %7 : vector<1x64xf32> to vector<8x64xf32>
    %9 = arith.addf %6, %8 : vector<8x64xf32>
    %10 = math.tanh %9 : vector<8x64xf32>
    %11 = arith.truncf %10 : vector<8x64xf32> to vector<8x64xbf16>
    %c0_11 = arith.constant 0 : index
    %c0_12 = arith.constant 0 : index
    %12 = vector.load %arg7[%c0_11, %c0_12] : memref<64x164xbf16, #tpu.memory_space<vmem>>, vector<64x164xbf16>
    %cst_13 = arith.constant dense<0.000000e+00> : vector<8x164xf32>
    %13 = tpu.matmul %11, %12, %cst_13 {dimension_numbers = #tpu.dot_dimension_numbers<[1], [0], [0], [1], [0, 0, 1, 1], [], []>} : vector<8x64xbf16>, vector<64x164xbf16>, vector<8x164xf32> -> vector<8x164xf32>
    %c0_14 = arith.constant 0 : index
    %c0_15 = arith.constant 0 : index
    %14 = vector.load %arg8[%c0_14, %c0_15] : memref<1x164xf32, #tpu.memory_space<vmem>>, vector<1x164xf32>
    %15 = vector.broadcast %14 : vector<1x164xf32> to vector<8x164xf32>
    %16 = arith.addf %13, %15 : vector<8x164xf32>
    %17 = vector.extract_strided_slice %16 {offsets = [0, 0], sizes = [8, 16], strides = [1, 1]} : vector<8x164xf32> to vector<8x16xf32>
    %18 = vector.extract_strided_slice %16 {offsets = [0, 16], sizes = [8, 16], strides = [1, 1]} : vector<8x164xf32> to vector<8x16xf32>
    %19 = vector.extract_strided_slice %16 {offsets = [0, 32], sizes = [8, 64], strides = [1, 1]} : vector<8x164xf32> to vector<8x64xf32>
    %20 = vector.extract_strided_slice %16 {offsets = [0, 96], sizes = [8, 64], strides = [1, 1]} : vector<8x164xf32> to vector<8x64xf32>
    %21 = vector.extract_strided_slice %16 {offsets = [0, 160], sizes = [8, 4], strides = [1, 1]} : vector<8x164xf32> to vector<8x4xf32>
    %cst_16 = arith.constant 5.000000e-01 : f32
    %22 = vector.broadcast %cst_16 : f32 to vector<8x16xf32>
    %23 = arith.mulf %22, %18 : vector<8x16xf32>
    %24 = math.exp %23 : vector<8x16xf32>
    %25 = arith.mulf %24, %2 : vector<8x16xf32>
    %26 = arith.addf %17, %25 : vector<8x16xf32>
    %cst_17 = arith.constant 1.000000e+00 : f32
    %27 = vector.broadcast %cst_17 : f32 to vector<8x16xf32>
    %28 = arith.addf %27, %18 : vector<8x16xf32>
    %29 = arith.mulf %17, %17 : vector<8x16xf32>
    %30 = arith.subf %28, %29 : vector<8x16xf32>
    %31 = arith.mulf %24, %24 : vector<8x16xf32>
    %32 = arith.subf %30, %31 : vector<8x16xf32>
    %cst_18 = arith.constant -5.000000e-01 : f32
    %33 = vector.broadcast %cst_18 : f32 to vector<8x16xf32>
    %34 = arith.mulf %33, %32 : vector<8x16xf32>
    %cst_19 = arith.constant dense<0xFF800000> : vector<8xf32>
    %35 = vector.multi_reduction <maximumf>, %21, %cst_19 [1] : vector<8x4xf32> to vector<8xf32>
    %36 = vector.shape_cast %35 : vector<8xf32> to vector<8x1xf32>
    %37 = vector.broadcast %36 : vector<8x1xf32> to vector<8x4xf32>
    %38 = arith.subf %21, %37 : vector<8x4xf32>
    %39 = math.exp %38 : vector<8x4xf32>
    %cst_20 = arith.constant dense<0.000000e+00> : vector<8xf32>
    %40 = vector.multi_reduction <add>, %39, %cst_20 [1] : vector<8x4xf32> to vector<8xf32>
    %41 = vector.shape_cast %40 : vector<8xf32> to vector<8x1xf32>
    %42 = vector.broadcast %41 : vector<8x1xf32> to vector<8x4xf32>
    %43 = arith.divf %39, %42 : vector<8x4xf32>
    %cst_21 = arith.constant 5.000000e-01 : f32
    %44 = vector.broadcast %cst_21 : f32 to vector<8x64xf32>
    %45 = arith.mulf %44, %20 : vector<8x64xf32>
    %46 = math.exp %45 : vector<8x64xf32>
    %47 = arith.mulf %46, %3 : vector<8x64xf32>
    %48 = arith.addf %19, %47 : vector<8x64xf32>
    %cst_22 = arith.constant 1.000000e+00 : f32
    %49 = vector.broadcast %cst_22 : f32 to vector<8x64xf32>
    %50 = arith.addf %49, %20 : vector<8x64xf32>
    %51 = arith.mulf %19, %19 : vector<8x64xf32>
    %52 = arith.subf %50, %51 : vector<8x64xf32>
    %53 = arith.mulf %46, %46 : vector<8x64xf32>
    %54 = arith.subf %52, %53 : vector<8x64xf32>
    %cst_23 = arith.constant -5.000000e-01 : f32
    %55 = vector.broadcast %cst_23 : f32 to vector<8x64xf32>
    %56 = arith.mulf %55, %54 : vector<8x64xf32>
    %57 = vector.extract_strided_slice %1 {offsets = [0, 0], sizes = [8, 1], strides = [1, 1]} : vector<8x2xf32> to vector<8x1xf32>
    %58 = vector.shape_cast %57 : vector<8x1xf32> to vector<8x1xf32>
    %59 = vector.broadcast %58 : vector<8x1xf32> to vector<8x16xf32>
    %60 = arith.mulf %59, %17 : vector<8x16xf32>
    %61 = arith.mulf %59, %18 : vector<8x16xf32>
    %62 = arith.mulf %59, %26 : vector<8x16xf32>
    %63 = arith.mulf %59, %34 : vector<8x16xf32>
    %64 = vector.extract_strided_slice %1 {offsets = [0, 1], sizes = [8, 1], strides = [1, 1]} : vector<8x2xf32> to vector<8x1xf32>
    %65 = vector.broadcast %64 : vector<8x1xf32> to vector<8x4xf32>
    %66 = arith.mulf %43, %65 : vector<8x4xf32>
    %67 = vector.extract_strided_slice %66 {offsets = [0, 0], sizes = [8, 1], strides = [1, 1]} : vector<8x4xf32> to vector<8x1xf32>
    %68 = vector.shape_cast %67 : vector<8x1xf32> to vector<8x1xf32>
    %69 = vector.broadcast %68 : vector<8x1xf32> to vector<8x16xf32>
    %70 = vector.extract_strided_slice %19 {offsets = [0, 0], sizes = [8, 16], strides = [1, 1]} : vector<8x64xf32> to vector<8x16xf32>
    %71 = arith.mulf %69, %70 : vector<8x16xf32>
    %72 = arith.addf %60, %71 : vector<8x16xf32>
    %73 = vector.extract_strided_slice %20 {offsets = [0, 0], sizes = [8, 16], strides = [1, 1]} : vector<8x64xf32> to vector<8x16xf32>
    %74 = arith.mulf %69, %73 : vector<8x16xf32>
    %75 = arith.addf %61, %74 : vector<8x16xf32>
    %76 = vector.extract_strided_slice %48 {offsets = [0, 0], sizes = [8, 16], strides = [1, 1]} : vector<8x64xf32> to vector<8x16xf32>
    %77 = arith.mulf %69, %76 : vector<8x16xf32>
    %78 = arith.addf %62, %77 : vector<8x16xf32>
    %79 = vector.extract_strided_slice %56 {offsets = [0, 0], sizes = [8, 16], strides = [1, 1]} : vector<8x64xf32> to vector<8x16xf32>
    %80 = arith.mulf %69, %79 : vector<8x16xf32>
    %81 = arith.addf %63, %80 : vector<8x16xf32>
    %82 = vector.extract_strided_slice %66 {offsets = [0, 1], sizes = [8, 1], strides = [1, 1]} : vector<8x4xf32> to vector<8x1xf32>
    %83 = vector.shape_cast %82 : vector<8x1xf32> to vector<8x1xf32>
    %84 = vector.broadcast %83 : vector<8x1xf32> to vector<8x16xf32>
    %85 = vector.extract_strided_slice %19 {offsets = [0, 16], sizes = [8, 16], strides = [1, 1]} : vector<8x64xf32> to vector<8x16xf32>
    %86 = arith.mulf %84, %85 : vector<8x16xf32>
    %87 = arith.addf %72, %86 : vector<8x16xf32>
    %88 = vector.extract_strided_slice %20 {offsets = [0, 16], sizes = [8, 16], strides = [1, 1]} : vector<8x64xf32> to vector<8x16xf32>
    %89 = arith.mulf %84, %88 : vector<8x16xf32>
    %90 = arith.addf %75, %89 : vector<8x16xf32>
    %91 = vector.extract_strided_slice %48 {offsets = [0, 16], sizes = [8, 16], strides = [1, 1]} : vector<8x64xf32> to vector<8x16xf32>
    %92 = arith.mulf %84, %91 : vector<8x16xf32>
    %93 = arith.addf %78, %92 : vector<8x16xf32>
    %94 = vector.extract_strided_slice %56 {offsets = [0, 16], sizes = [8, 16], strides = [1, 1]} : vector<8x64xf32> to vector<8x16xf32>
    %95 = arith.mulf %84, %94 : vector<8x16xf32>
    %96 = arith.addf %81, %95 : vector<8x16xf32>
    %97 = vector.extract_strided_slice %66 {offsets = [0, 2], sizes = [8, 1], strides = [1, 1]} : vector<8x4xf32> to vector<8x1xf32>
    %98 = vector.shape_cast %97 : vector<8x1xf32> to vector<8x1xf32>
    %99 = vector.broadcast %98 : vector<8x1xf32> to vector<8x16xf32>
    %100 = vector.extract_strided_slice %19 {offsets = [0, 32], sizes = [8, 16], strides = [1, 1]} : vector<8x64xf32> to vector<8x16xf32>
    %101 = arith.mulf %99, %100 : vector<8x16xf32>
    %102 = arith.addf %87, %101 : vector<8x16xf32>
    %103 = vector.extract_strided_slice %20 {offsets = [0, 32], sizes = [8, 16], strides = [1, 1]} : vector<8x64xf32> to vector<8x16xf32>
    %104 = arith.mulf %99, %103 : vector<8x16xf32>
    %105 = arith.addf %90, %104 : vector<8x16xf32>
    %106 = vector.extract_strided_slice %48 {offsets = [0, 32], sizes = [8, 16], strides = [1, 1]} : vector<8x64xf32> to vector<8x16xf32>
    %107 = arith.mulf %99, %106 : vector<8x16xf32>
    %108 = arith.addf %93, %107 : vector<8x16xf32>
    %109 = vector.extract_strided_slice %56 {offsets = [0, 32], sizes = [8, 16], strides = [1, 1]} : vector<8x64xf32> to vector<8x16xf32>
    %110 = arith.mulf %99, %109 : vector<8x16xf32>
    %111 = arith.addf %96, %110 : vector<8x16xf32>
    %112 = vector.extract_strided_slice %66 {offsets = [0, 3], sizes = [8, 1], strides = [1, 1]} : vector<8x4xf32> to vector<8x1xf32>
    %113 = vector.shape_cast %112 : vector<8x1xf32> to vector<8x1xf32>
    %114 = vector.broadcast %113 : vector<8x1xf32> to vector<8x16xf32>
    %115 = vector.extract_strided_slice %19 {offsets = [0, 48], sizes = [8, 16], strides = [1, 1]} : vector<8x64xf32> to vector<8x16xf32>
    %116 = arith.mulf %114, %115 : vector<8x16xf32>
    %117 = arith.addf %102, %116 : vector<8x16xf32>
    %118 = vector.extract_strided_slice %20 {offsets = [0, 48], sizes = [8, 16], strides = [1, 1]} : vector<8x64xf32> to vector<8x16xf32>
    %119 = arith.mulf %114, %118 : vector<8x16xf32>
    %120 = arith.addf %105, %119 : vector<8x16xf32>
    %121 = vector.extract_strided_slice %48 {offsets = [0, 48], sizes = [8, 16], strides = [1, 1]} : vector<8x64xf32> to vector<8x16xf32>
    %122 = arith.mulf %114, %121 : vector<8x16xf32>
    %123 = arith.addf %108, %122 : vector<8x16xf32>
    %124 = vector.extract_strided_slice %56 {offsets = [0, 48], sizes = [8, 16], strides = [1, 1]} : vector<8x64xf32> to vector<8x16xf32>
    %125 = arith.mulf %114, %124 : vector<8x16xf32>
    %126 = arith.addf %111, %125 : vector<8x16xf32>
    %127 = arith.truncf %43 : vector<8x4xf32> to vector<8x4xbf16>
    %c0_24 = arith.constant 0 : index
    %c0_25 = arith.constant 0 : index
    %128 = vector.load %arg9[%c0_24, %c0_25] : memref<8x128xbf16, #tpu.memory_space<vmem>>, vector<8x4xbf16>
    tpu.vector_store %arg9[%c0_24, %c0_25], %127 {strides = array<i32>} : memref<8x128xbf16, #tpu.memory_space<vmem>>, vector<8x4xbf16>,
    %129 = arith.truncf %117 : vector<8x16xf32> to vector<8x16xbf16>
    %c0_26 = arith.constant 0 : index
    %c4 = arith.constant 4 : index
    %130 = vector.load %arg9[%c0_26, %c4] : memref<8x128xbf16, #tpu.memory_space<vmem>>, vector<8x16xbf16>
    tpu.vector_store %arg9[%c0_26, %c4], %129 {strides = array<i32>} : memref<8x128xbf16, #tpu.memory_space<vmem>>, vector<8x16xbf16>,
    %131 = arith.truncf %120 : vector<8x16xf32> to vector<8x16xbf16>
    %c0_27 = arith.constant 0 : index
    %c20 = arith.constant 20 : index
    %132 = vector.load %arg9[%c0_27, %c20] : memref<8x128xbf16, #tpu.memory_space<vmem>>, vector<8x16xbf16>
    tpu.vector_store %arg9[%c0_27, %c20], %131 {strides = array<i32>} : memref<8x128xbf16, #tpu.memory_space<vmem>>, vector<8x16xbf16>,
    %133 = arith.truncf %123 : vector<8x16xf32> to vector<8x16xbf16>
    %c0_28 = arith.constant 0 : index
    %c36 = arith.constant 36 : index
    %134 = vector.load %arg9[%c0_28, %c36] : memref<8x128xbf16, #tpu.memory_space<vmem>>, vector<8x16xbf16>
    tpu.vector_store %arg9[%c0_28, %c36], %133 {strides = array<i32>} : memref<8x128xbf16, #tpu.memory_space<vmem>>, vector<8x16xbf16>,
    %135 = arith.truncf %126 : vector<8x16xf32> to vector<8x16xbf16>
    %c0_29 = arith.constant 0 : index
    %c52 = arith.constant 52 : index
    %136 = vector.load %arg9[%c0_29, %c52] : memref<8x128xbf16, #tpu.memory_space<vmem>>, vector<8x16xbf16>
    tpu.vector_store %arg9[%c0_29, %c52], %135 {strides = array<i32>} : memref<8x128xbf16, #tpu.memory_space<vmem>>, vector<8x16xbf16>,
    %cst_30 = arith.constant 0.000000e+00 : bf16
    %137 = vector.broadcast %cst_30 : bf16 to vector<8x60xbf16>
    %c0_31 = arith.constant 0 : index
    %c68 = arith.constant 68 : index
    %138 = vector.load %arg9[%c0_31, %c68] : memref<8x128xbf16, #tpu.memory_space<vmem>>, vector<8x60xbf16>
    tpu.vector_store %arg9[%c0_31, %c68], %137 {strides = array<i32>} : memref<8x128xbf16, #tpu.memory_space<vmem>>, vector<8x60xbf16>,
    return
  }
  func.func @transform_0(%arg0: i32) -> (i32, i32) {
    %c0_i32 = arith.constant 0 : i32
    %c0_i32_0 = arith.constant 0 : i32
    return %arg0, %c0_i32 : i32, i32
  }
  func.func @transform_1(%arg0: i32) -> (i32, i32) {
    %c0_i32 = arith.constant 0 : i32
    %c0_i32_0 = arith.constant 0 : i32
    return %arg0, %c0_i32 : i32, i32
  }
  func.func @transform_2(%arg0: i32) -> (i32, i32) {
    %c0_i32 = arith.constant 0 : i32
    %c0_i32_0 = arith.constant 0 : i32
    return %arg0, %c0_i32 : i32, i32
  }
  func.func @transform_3(%arg0: i32) -> (i32, i32) {
    %c0_i32 = arith.constant 0 : i32
    %c0_i32_0 = arith.constant 0 : i32
    return %arg0, %c0_i32 : i32, i32
  }
  func.func @transform_4(%arg0: i32) -> (i32, i32) {
    %c0_i32 = arith.constant 0 : i32
    %c0_i32_0 = arith.constant 0 : i32
    %c0_i32_1 = arith.constant 0 : i32
    return %c0_i32, %c0_i32_0 : i32, i32
  }
  func.func @transform_5(%arg0: i32) -> (i32, i32) {
    %c0_i32 = arith.constant 0 : i32
    %c0_i32_0 = arith.constant 0 : i32
    %c0_i32_1 = arith.constant 0 : i32
    return %c0_i32, %c0_i32_0 : i32, i32
  }
  func.func @transform_6(%arg0: i32) -> (i32, i32) {
    %c0_i32 = arith.constant 0 : i32
    %c0_i32_0 = arith.constant 0 : i32
    %c0_i32_1 = arith.constant 0 : i32
    return %c0_i32, %c0_i32_0 : i32, i32
  }
  func.func @transform_7(%arg0: i32) -> (i32, i32) {
    %c0_i32 = arith.constant 0 : i32
    %c0_i32_0 = arith.constant 0 : i32
    %c0_i32_1 = arith.constant 0 : i32
    return %c0_i32, %c0_i32_0 : i32, i32
  }
  func.func @transform_8(%arg0: i32) -> (i32, i32) {
    %c0_i32 = arith.constant 0 : i32
    %c0_i32_0 = arith.constant 0 : i32
    return %arg0, %c0_i32 : i32, i32
  }
}

</mosaic_0001>

<bundles_post_ra>
// kernel: tpu_custom_call.1
= control target key start
LH: loop header
LB: loop body
LE: loop exit
PB: predicated region body
PF: predicated region fallthrough
CT: control target
= control target key end

     0   :  { %s1720_s0 = inlined_call_operand.vmem [shape: f32[16,32], index: 0, kind: input, shape index: {}]   ;;  %s1721_s1 = inlined_call_operand.vmem [shape: f32[16,2], index: 1, kind: input, shape index: {}]   ;;  %s1722_s2 = inlined_call_operand.hbm [shape: f32[16,16], index: 2, kind: input, shape index: {}]   ;;  %s1723_s3 = inlined_call_operand.hbm [shape: f32[16,64], index: 3, kind: input, shape index: {}]   ;;  %s1724_s4 = inlined_call_operand.hbm [shape: bf16[32,64], index: 4, kind: input, shape index: {}]   ;;  %s1725_s5 = inlined_call_operand.vmem [shape: f32[1,64], index: 5, kind: input, shape index: {}]   ;;  %s1726_s6 = inlined_call_operand.hbm [shape: bf16[64,164], index: 6, kind: input, shape index: {}]   ;;  %s1727_s7 = inlined_call_operand.vmem [shape: f32[1,164], index: 7, kind: input, shape index: {}]   ;;  %s1728_s8 = inlined_call_operand.hbm [shape: bf16[16,128], index: 8, kind: output, shape index: {}]  }
   0x1   :  { %1736 = sst [smem:[#allocation19_spill]] %s1724_s4 }
   0x2   :  { %1737 = sst [smem:[#allocation20_spill]] %s1726_s6 }
   0x3   :  { %13 = vsyncpa [#allocation3], 0 }
   0x4   :  { %15 = vsyncpa [#allocation3 + $0x1], 0 }
   0x5   :  { %16 = vsyncpa [#allocation6], 0 }
   0x6   :  { %18 = vsyncpa [#allocation6 + $0x1], 0 }
   0x7   :  { %19 = vsyncpa [#allocation9], 0 }
   0x8   :  { %20 = vsyncpa [#allocation4], 0 }
   0x9   :  { %22 = vsyncpa [#allocation4 + $0x1], 0  ;;  %s1416_s27 = smov 0   ;;  %s1418_s28 = smov 0  }
   0xa   :  { %s1420_s29 = smov 0   ;;  %s1422_s30 = smov 0  }
   0xb LB: > { %1738 = sst [smem:[#allocation16_spill]] %s1339_s29  ;;  %s1437_s9 = sadd.s32 4294967295, %s1343_s30   ;;  %s1343_s30 = sphi %s1422_s30, %s1759_s30   ;;  %s1339_s29 = sphi %s1420_s29, %s1761_s29   ;;  %s1335_s28 = sphi %s1418_s28, %s1763_s28   ;;  %s1331_s27 = sphi %s1416_s27, %s1762_s27  }
   0xc   : > { %s981_s10 = sadd.s32 4294967294, %s1343_s30   ;;  %p100_p0 = scmp.ne.s32.totalorder %s1335_s28, %s1331_s27 }
   0xd   : > { %p1729_p1 = scmp.eq.s32.totalorder %s1437_s9, 0  ;;  %p240_p3 = scmp.eq.s32.totalorder %s981_s10, 1 }
   0xe   : > { %p982_p5 = scmp.ge.s32.totalorder %s1343_s30, 1  ;;  %p247_p7 = scmp.lt.s32.totalorder %s1343_s30, 3 }
   0xf   : > { %p1446_p4 = por %p1729_p1, %p100_p0  ;;  %p1451_p6 = por %p240_p3, %p100_p0 }
  0x10   : > { %p1456_p8 = pnand %p982_p5, %p247_p7  ;;  %s1345_s14 = smov [#allocation7]  }
  0x11   : > { %s1739_s11 = scalar_select %p1446_p4, 1, 0 }
  0x12   : > { %s1740_s12 = scalar_select %p1451_p6, 1, 0 }
  0x13   : > { %s1741_s13 = scalar_select %p1456_p8, 1, 0 }
  0x14   : > { %s259_s15 = sshll.u32 %s1345_s14, 4  ;;  %p1050_p9 = pneg %p1456_p8  ;;  %s260_s15 = int_to_ptr.vmem [resolvable:$true] %s259_s15 }
  0x15   : > { %s1346_s17 = smov [#allocation8]   ;;  %s1170_s19 = scalar_lea.vmem %s260_s15, 256 }
  0x16   : > { %p1465_p11 = pnand %p1050_p9, %p1729_p1  ;;  %s275_s18 = sshll.u32 %s1346_s17, 4  ;;  %s276_s18 = int_to_ptr.vmem [resolvable:$true] %s275_s18 }
  0x17   : > { %p1171_p13 = scmp.ne.s32.totalorder %s260_s15, %s1170_s19  ;;  %p1178_p5 = scmp.lt.s32.totalorder %s260_s15, %s260_s15 }
  0x18   : > { %p1161_p12 = pneg %p1465_p11  ;;  %p1179_p7 = scmp.lt.s32.totalorder %s1170_s19, %s1170_s19 }
  0x1a   : > { %p1173_p0 = pnand %p1171_p13, %p1161_p12  ;;  %p1180_p10 = por %p1179_p7, %p1178_p5 }
  0x1c   : > { %p1174_p3 = pneg %p1173_p0 }
  0x1e   : > { %p1181_p9 = pnand %p1180_p10, %p1174_p3 }
  0x20   : > { %1184 = shalt.err (!%p1181_p9)
}
  0x21   : > { %s1347_s20 = smov 64   ;;  %s1348_s21 = smov 4  }
  0x22   : > { %s1743_s4 = sld [smem:[#allocation19_spill]]  ;;  %s1196_s24 = scalar_lea.vmem %s276_s18, 1024 }
  0x23   : > { %p1197_p1 = scmp.ne.s32.totalorder %s276_s18, %s1196_s24  ;;  %p1204_p2 = scmp.lt.s32.totalorder %s276_s18, %s276_s18 }
  0x24   : > { %p1205_p6 = scmp.lt.s32.totalorder %s1196_s24, %s1196_s24 }
  0x25   : > { %p1199_p13 = pnand %p1197_p1, %p1161_p12 }
  0x26   : > { %p1206_p5 = por %p1205_p6, %p1204_p2 }
  0x27   : > { %p1200_p0 = pneg %p1199_p13 }
  0x28   : > { %1053 = dma.hbm_to_vmem [thread:$0]  (!%p1465_p11), %s1743_s4, 256, %s260_s15, [#allocation6], %s1347_s20, %s1347_s20, %s1348_s21  }
  0x29   : > { %p1207_p10 = pnand %p1206_p5, %p1200_p0 }
  0x2b   : > { %1210 = shalt.err (!%p1207_p10)
}
  0x2c   : > { %s1349_s25 = smov 128   ;;  %s1350_s26 = smov 8  }
  0x2d   : > { %s1744_s6 = sld [smem:[#allocation20_spill]]  ;;  %s1488_s15 = sadd.s32 1, %s1343_s30  }
  0x2e   : > { %1745 = sst [smem:[#allocation17_spill]] %s1488_s15  ;;  %s84_s17 = ssub.s32 %s1343_s30, %s1488_s15 }
  0x2f   : > { %p85_p1 = scmp.eq.s32.totalorder %s84_s17, 0  ;;  %s87_s19 = sadd.s32 1, %s1339_s29 }
  0x30   : > { %p94_p2 = scmp.ne.s32.totalorder %s1339_s29, %s1335_s28  ;;  %p95_p6 = scmp.eq.s32.totalorder %s1343_s30, 0 }
  0x31   : > { %s1497_s20 = scalar_select %p85_p1, %s1339_s29, %s87_s19  }
  0x32   : > { %p96_p12 = por %p95_p6, %p94_p2  ;;  %p1747_p3 = scmp.eq.s32.totalorder %s1437_s9, 1 }
  0x33   : > { %1056 = dma.hbm_to_vmem [thread:$0]  (!%p1465_p11), %s1744_s6, 1024, %s276_s18, [#allocation9], %s1349_s25, %s1349_s25, %s1350_s26  }
  0x34   : > { %1746 = sst [smem:[#allocation18_spill]] %s1497_s20  ;;  %p1501_p7 = por %p1747_p3, %p94_p2 }
  0x35   : > { %p1070_p9 = scmp.lt.s32.totalorder %s1343_s30, 2  ;;  %s306_s16 = sand.u32 1, %s1339_s29  }
  0x36   : > { %s1748_s21 = scalar_select %p1501_p7, 1, 0 }
  0x37   : > { %s1507_s18 = sshll.u32 %s306_s16, 3  ;;  %s987_s22 = sshll.u32 %s1343_s30, 7 }
  0x38   : > { %s1513_s25 = scalar_lea.hbm %s1722_s2, %s987_s22  ;;  %s310_s26 = scalar_lea.vmem [#allocation2], %s1507_s18 }
  0x39   : > { %s317_s10 = sshll.u32 %s310_s26, 4  ;;  %p1518_p11 = pnand %p1070_p9, %p96_p12  ;;  %s1516_s10 = int_to_ptr.vmem [resolvable:$true] %s317_s10 }
  0x3a   : > { %s1525_s4 = scalar_lea.hbm %s1723_s3, %s987_s22  ;;  %s324_s23 = sand.u32 1, %s1343_s30  }
  0x3b   : > { %s307_s24 = scalar_lea.sflag [#allocation3], %s306_s16  ;;  %s1211_s6 = scalar_lea.hbm %s1513_s25, 128 }
  0x3c   : > { %p1212_p13 = scmp.ne.s32.totalorder %s1513_s25, %s1211_s6  ;;  %p1213_p0 = pneg %p1518_p11 }
  0x3d   : > { %s1216_s29 = scalar_lea.hbm %s1722_s2, 256  ;;  %p1217_p1 = scmp.lt.s32.totalorder %s1513_s25, %s1722_s2 }
  0x3e   : > { %p1214_p5 = pnand %p1213_p0, %p1212_p13  ;;  %p1218_p2 = scmp.lt.s32.totalorder %s1216_s29, %s1211_s6 }
  0x40   : > { %p1215_p10 = pneg %p1214_p5  ;;  %p1219_p6 = por %p1218_p2, %p1217_p1 }
  0x42   : > { %p1220_p12 = pnand %p1219_p6, %p1215_p10 }
  0x44   : > { %1223 = shalt.err (!%p1220_p12)
}
  0x45   : > { %s1224_s16 = scalar_lea.vmem %s1516_s10, 128  ;;  %s1351_s20 = smov [#allocation2]  }
  0x46   : > { %p1225_p3 = scmp.ne.s32.totalorder %s1516_s10, %s1224_s16  ;;  %s1229_s22 = sshll.u32 %s1351_s20, 4  ;;  %s1230_s22 = int_to_ptr.vmem [resolvable:$false] %s1229_s22 }
  0x47   : > { %s1231_s19 = scalar_lea.vmem %s1230_s22, 256  ;;  %p1232_p5 = scmp.lt.s32.totalorder %s1516_s10, %s1230_s22 }
  0x48   : > { %p1227_p9 = pnand %p1225_p3, %p1213_p0  ;;  %p1233_p7 = scmp.lt.s32.totalorder %s1231_s19, %s1224_s16 }
  0x4a   : > { %p1228_p13 = pneg %p1227_p9  ;;  %p1234_p4 = por %p1233_p7, %p1232_p5 }
  0x4c   : > { %p1235_p1 = pnand %p1234_p4, %p1228_p13 }
  0x4e   : > { %1238 = shalt.err (!%p1235_p1)
}
  0x4f   : > { %1060 = dma.hbm_to_vmem [thread:$0]  (!%p1518_p11), %s1513_s25, 128, %s1516_s10, %s307_s24  }
  0x50   : > { %s328_s6 = scalar_lea.vmem [#allocation5], %s1507_s18  ;;  %s325_s15 = scalar_lea.sflag [#allocation6], %s324_s23 }
  0x51   : > { %s335_s29 = sshll.u32 %s328_s6, 4  ;;  %s1239_s26 = scalar_lea.hbm %s1525_s4, 128  ;;  %s336_s29 = int_to_ptr.vmem [resolvable:$true] %s335_s29 }
  0x52   : > { %p1240_p7 = scmp.ne.s32.totalorder %s1525_s4, %s1239_s26  ;;  %s1244_s20 = scalar_lea.hbm %s1723_s3, 256 }
  0x53   : > { %p1245_p2 = scmp.lt.s32.totalorder %s1525_s4, %s1723_s3  ;;  %p1246_p6 = scmp.lt.s32.totalorder %s1244_s20, %s1239_s26 }
  0x54   : > { %p1242_p4 = pnand %p1240_p7, %p1213_p0 }
  0x55   : > { %p1247_p12 = por %p1246_p6, %p1245_p2 }
  0x56   : > { %p1243_p10 = pneg %p1242_p4 }
  0x58   : > { %p1248_p3 = pnand %p1247_p12, %p1243_p10 }
  0x5a   : > { %1251 = shalt.err (!%p1248_p3)
}
  0x5b   : > { %s1252_s18 = scalar_lea.vmem %s336_s29, 128  ;;  %s1352_s25 = smov [#allocation5]  }
  0x5c   : > { %p1253_p9 = scmp.ne.s32.totalorder %s336_s29, %s1252_s18  ;;  %s1257_s10 = sshll.u32 %s1352_s25, 4  ;;  %s1258_s10 = int_to_ptr.vmem [resolvable:$false] %s1257_s10 }
  0x5d   : > { %s1259_s23 = scalar_lea.vmem %s1258_s10, 256  ;;  %p1260_p1 = scmp.lt.s32.totalorder %s336_s29, %s1258_s10 }
  0x5e   : > { %p1255_p13 = pnand %p1253_p9, %p1213_p0  ;;  %p1261_p7 = scmp.lt.s32.totalorder %s1259_s23, %s1252_s18 }
  0x60   : > { %p1256_p5 = pneg %p1255_p13  ;;  %p1262_p4 = por %p1261_p7, %p1260_p1 }
  0x62   : > { %p1263_p8 = pnand %p1262_p4, %p1256_p5 }
  0x64   : > { %1266 = shalt.err (!%p1263_p8)
}
  0x65   : > { %1063 = dma.hbm_to_vmem [thread:$0]  (!%p1518_p11), %s1525_s4, 128, %s336_s29, %s325_s15  }
  0x66   : > { %p1750_p10 = scmp.ne.s32.totalorder %s1741_s13, 0 }
  0x67   : > { %s1576_s24 = sand.u32 (!%p1750_p10), 1, %s1335_s28   ;;  %p1751_p0 = scmp.ne.s32.totalorder (!%p1750_p10), %s1739_s11, 0 }
  0x68   : > { %344 = sbr.rel (%p1750_p10) target bundleno = 1365 (0x555), region = 52  ;;  %s991_s6 = sshll.u32 (!%p1750_p10), %s1576_s24, 3 }
  0x69   : > { %s347_s26 = scalar_lea.sflag (!%p1750_p10), [#allocation3], %s1576_s24  ;;  %s1580_s17 = scalar_lea.vmem (!%p1750_p10), [#allocation2], %s991_s6 }
  0x6d   : > { %1310 = dma.done.wait (%p1751_p0), %s347_s26, 128  }
  0x6e   : > { %1312 = vsyncadd (%p1751_p0), %s347_s26, 4294967168  ;;  %s355_s4 = sand.u32 1, %s1437_s9   ;;  %s1587_s14 = scalar_lea.vmem [#allocation5], %s991_s6 }
  0x6f   : > { %s356_s13 = scalar_lea.sflag [#allocation6], %s355_s4 }
  0x70   : > { %1314 = dma.done.wait (%p1751_p0), %s356_s13, 128  }
  0x71   : > { %1316 = vsyncadd (%p1751_p0), %s356_s13, 4294967168  ;;  %p1752_p8 = scmp.eq.s32.totalorder %s1437_s9, 0 }
  0x73   : > { %1318 = dma.done.wait (%p1752_p8), [#allocation6], 256   ;;  %p1753_p11 = pmov %p1752_p8 }
  0x74   : > { %p1754_p2 = pmov %p1752_p8 }
  0x75   : > { %1320 = vsyncadd (%p1753_p11), [#allocation6], 4294967040 }
  0x76   : > { %1322 = dma.done.wait (%p1754_p2), [#allocation9], 1024   ;;  %p1755_p6 = pmov %p1754_p2 }
  0x77   : > { %p413_p12 = scmp.lt.s32.totalorder %s1437_s9, 1  ;;  %v1353_v0 = vmov 0.0   ;;  %vm1354_vm0 = vmmov 0   ;;  %v1135_v1 = vld [vmem:[#allocation7 + $0x8] sm:$0xff]   ;;  %v1136_v2 = vld [vmem:[#allocation7] sm:$0xff]   ;;  %vm450_vm1 = vcmask 261120   ;;  %v506_v22 = vlaneseq }
  0x78   : > { %1324 = vsyncadd (%p1755_p6), [#allocation9], 4294966272  ;;  %1028 = vmatprep.subr.bf16.mxu0 %v1353_v0  ;;  %1032 = vmatprep.mubr.msk.bf16.mxu0 %vm1354_vm0, %v1353_v0  ;;  %v1137_v5 = vld [vmem:[#allocation8 + $0x34] ss:$8 sps:$4 sm:$0xff]   ;;  %v1139_v6 = vld [vmem:[#allocation8 + $0x30] ss:$8 sps:$4 sm:$0xff]  }
  0x79   : > { %s1603_s11 = scalar_select %p413_p12, %s1437_s9, 1  ;;  %1029 = vmatpush3.bf16.msra.mxu0 %v1135_v1  ;;  %568 = vmatprep.subr.bf16.mxu1 %v1137_v5  ;;  %v1140_v7 = vld [vmem:[#allocation8 + $0x24] ss:$8 sps:$4 sm:$0xff]   ;;  %v1142_v8 = vld [vmem:[#allocation8 + $0x20] ss:$8 sps:$4 sm:$0xff]   ;;  %v1355_v13 = vmov 0  }
  0x7a   : > { %1030 = vmatprep.subr.bf16.mxu0 %v1353_v0  ;;  %569 = vmatpush1.bf16.msra.mxu1 %v1139_v6  ;;  %v1143_v9 = vld [vmem:[#allocation8 + $0x14] ss:$8 sps:$4 sm:$0xff]   ;;  %v1145_v10 = vld [vmem:[#allocation8 + $0x10] ss:$8 sps:$4 sm:$0xff]   ;;  %v1146_v11 = vld [vmem:[#allocation8 + $0x4] ss:$8 sps:$4 sm:$0xff]  }
  0x7b   : > { %s996_s29 = sshll.u32 %s1603_s11, 3  ;;  %570 = vmatprep.subr.bf16.mxu1 %v1140_v7  ;;  %v1148_v12 = vld [vmem:[#allocation8] ss:$8 sps:$4 sm:$0xff]   ;;  %592 = vmatprep.mubr.bf16.mxu1 %v1355_v13  ;;  %v998_v14 = vld [vmem:[%s1725_s5] ss:$0 sm:$0xff]  ;;  %vm556_vm2 = vcmask 523264  }
  0x7c   : > { %s416_s20 = scalar_lea.vmem %s1720_s0, %s996_s29  ;;  %v507_v23 = vshrl.u32 %v506_v22, 7  ;;  %v504_v25 = vld [vmem:[%s1727_s7] sm:$0x3]  ;;  %vm624_vm3 = vcmask 294144   ;;  %s420_s6 = scalar_lea.vmem %s1721_s1, %s996_s29  ;;  %v1356_v33 = vmov 1   ;;  %vm635_vm4 = vcmask 31744  }
  0x7d   : > { %v422_v3 = vld [vmem:[%s416_s20] sm:$0xff]  ;;  %1031 = vmatpush3.bf16.msra.mxu0 %v1136_v2  ;;  %1129 = vset.pattern.permute.xlu1 %v1356_v33  ;;  %s1357_s26 = smov 96   ;;  %s1358_s4 = smov 64   ;;  %v425_v46 = vld [vmem:[%s1587_s14] sm:$0xff]  ;;  %v1360_v47 = vmov 35   ;;  %v1361_v48 = vmov 32  }
  0x7e   : > { %v426_v4 = vpack.c.bf16 %v422_v3, %v422_v3  ;;  %571 = vmatpush1.bf16.msra.mxu1 %v1142_v8  ;;  %v512_v24 = vsub.s32 1, %v507_v23  ;;  %v423_v34 = vld [vmem:[%s420_s6] sm:$0xff]  ;;  %v508_v38 = vsub.s32 0, %v507_v23  ;;  %s1359_s13 = smov 16   ;;  %1133 = vset.pattern.permute.xlu0 %v1360_v47  ;;  %v1362_v2 = vmov 33   ;;  %s1365_s14 = smov 48  }
  0x7f   : > { %572 = vmatprep.subr.bf16.mxu1 %v1143_v9  ;;  %679 = vperm.xlu1 %1129, %v423_v34   ;;  %v424_v43 = vld [vmem:[%s1580_s17] sm:$0xff]  ;;  %s1363_s17 = smov 112   ;;  %v1364_v3 = vmov 34   ;;  %s1366_s11 = smov 80   ;;  %vm791_vm5 = vcmask 27648   ;;  %vm800_vm6 = vcmask 158752  }
  0x80   : > { %1033 = vmatmul.mubr.msk.bf16.vlgmr.msra.gmra.mxu0 %vm450_vm1, %v426_v4  ;;  %v513_v26 = vrot.slane %v504_v25, %v512_v24  ;;  %v509_v39 = vrot.slane %v504_v25, %v508_v38  ;;  %s1367_s29 = smov 32   ;;  %s995_s15 = sshll.u32 %s1576_s24, 2  ;;  %vm809_vm7 = vcmask 289952   ;;  %vm818_vm8 = vcmask 421152  }
  0x81   : > { %s1368_s16 = smov 4   ;;  %s412_s20 = scalar_lea.vmem [#allocation10], %s995_s15  ;;  %vm827_vm9 = vcmask 552352   ;;  %vm829_vm10 = vcmask 1044000  }
  0x82   : > { %573 = vmatpush1.bf16.msra.mxu1 %v1145_v10  ;;  %s1369_s22 = smov 36   ;;  %s1017_s19 = sshll.u32 %s1437_s9, 6 }
  0x83   : > { %574 = vmatprep.subr.bf16.mxu1 %v1146_v11  ;;  %1130 = vset.pattern.permute.xlu1 %v1361_v48  ;;  %s845_s18 = sshll.u32 %s412_s20, 4  ;;  %s1682_s23 = scalar_lea.hbm %s1728_s8, %s1017_s19  ;;  %s846_s18 = int_to_ptr.vmem [resolvable:$true] %s845_s18 }
  0x84   : > { %s832_s6 = scalar_lea.sflag [#allocation4], %s1576_s24  ;;  %p1756_p9 = scmp.ne.s32.totalorder %s1748_s21, 0 }
  0x85   : > { %s1370_s9 = smov [#allocation10]  }
  0x86   : > { %575 = vmatpush1.bf16.msra.mxu1 %v1148_v12 }
  0xfa   : > { %v680_v53 = vpop.permute.xlu1 %679 }
 0x140   : > { %v488_v15 = vpop.f32.mrf.mxu0 }
 0x141   : > { %v489_v16 = vadd.f32 %v998_v14, %v488_v15 }
 0x142   : > { %v1034_v17 = vpop.f32.mrf.mxu0 }
 0x143   : > { %1149 = vtanh.f32 %v489_v16 }
 0x144   : > { %v491_v18 = vpop.f32.mrf.mxu0 }
 0x146   : > { %v1035_v19 = vpop.f32.mrf.mxu0 }
 0x150   : > { %v1150_v20 = vpop.eup %1149 }
 0x151   : > { %v495_v21 = vpack.c.bf16 %v1150_v20, %v1150_v20 }
 0x153   : > { %1010 = vmatmul.mubr.msk.bf16.vlgmr.msra.gmra.mxu1 %vm556_vm2, %v495_v21 }
 0x213   : > { %v594_v27 = vpop.f32.mrf.mxu1 }
 0x214   : > { %v1628_v40 = vadd.f32 %v594_v27, %v509_v39 }
 0x215   : > { %v596_v28 = vpop.f32.mrf.mxu1 }
 0x216   : > { %v1619_v29 = vadd.f32 %v596_v28, %v513_v26  ;;  %v615_v42 = vmul.f32 %v1628_v40, %v1628_v40  ;;  %v601_v49 = vmul.f32 0.5, %v1628_v40  ;;  %v614_v10 = vadd.f32 1.0, %v1628_v40 }
 0x217   : > { %v598_v30 = vpop.f32.mrf.mxu1 }
 0x218   : > { %v625_v31 = vsel %vm624_vm3, %v1619_v29, -inf  ;;  %v641_v50 = vmul.f32 0.5, %v1619_v29  ;;  %v602_v51 = vmul.f32 1.442695, %v601_v49  ;;  %v659_v4 = vadd.f32 1.0, %v1619_v29 }
 0x219   : > { %v599_v32 = vpop.f32.mrf.mxu1  ;;  %626 = vmax.xlane.f32.xlu0 %v625_v31 }
 0x21a   : > { %v642_v52 = vmul.f32 1.442695, %v641_v50 }
 0x2a2   : > { %v627_v35 = vpop.xlane.xlu0 %626 }
 0x2a3   : > { %v628_v36 = vsub.f32 %v1619_v29, %v627_v35 }
 0x2a5   : > { %v629_v37 = vmul.f32 1.442695, %v628_v36 }
 0x2a7   : > { %1151 = vpow2.f32 %v629_v37 }
 0x2a8   : > { %1153 = vpow2.f32 %v602_v51 }
 0x2a9   : > { %1155 = vpow2.f32 %v642_v52 }
 0x2b4   : > { %v1152_v41 = vpop.eup %1151 }
 0x2b5   : > { %632 = vrot.lane.b32.xlu0 %v1152_v41, %s1357_s26  ;;  %v1154_v55 = vpop.eup %1153 }
 0x2b6   : > { %v1156_v56 = vpop.eup %1155  ;;  %v621_v17 = vmul.f32 %v1154_v55, %v1154_v55 }
 0x2b7   : > { %v665_v6 = vmul.f32 %v1156_v56, %v1156_v56 }
 0x2b9   : > { %660 = vrot.lane.b32.xlu0 %v615_v42, %s1358_s4 }
 0x2bd   : > { %605 = vrot.lane.b32.xlu0 %v424_v43, %s1359_s13 }
 0x327   : > { %v633_v44 = vpop.permute.xlu0 %632 }
 0x328   : > { %v636_v45 = vsel %vm635_vm4, %v633_v44, 0.0 }
 0x329   : > { %637 = vadd.xlane.f32.xlu1 %v636_v45 }
 0x32b   : > { %v661_v60 = vpop.permute.xlu0 %660 }
 0x32c   : > { %v664_v5 = vsub.f32 %v659_v4, %v661_v60  ;;  %v663_v11 = vsub.f32 %v614_v10, %v661_v60 }
 0x32e   : > { %v667_v7 = vsub.f32 %v664_v5, %v665_v6  ;;  %v666_v20 = vsub.f32 %v663_v11, %v621_v17 }
 0x32f   : > { %v606_v0 = vpop.permute.xlu0 %605 }
 0x330   : > { %v608_v1 = vmul.f32 %v1154_v55, %v606_v0  ;;  %v669_v12 = vmul.f32 -0.5, %v667_v7  ;;  %v668_v25 = vmul.f32 -0.5, %v666_v20 }
 0x33a   : > { %645 = vrot.lane.b32.xlu1 %v425_v46, %s1357_s26 }
 0x3b2   : > { %v638_v54 = vpop.xlane.xlu1 %637 }
 0x3b3   : > { %1157 = vrcp.f32 %v638_v54 }
 0x3b6   : > { %v646_v57 = vpop.permute.xlu1 %645 }
 0x3b7   : > { %v648_v58 = vmul.f32 %v1154_v55, %v646_v57  ;;  %v649_v59 = vmul.f32 %v1156_v56, %v646_v57 }
 0x3b9   : > { %654 = vrot.lane.b32.xlu0 %v649_v59, %s1358_s4  ;;  %652 = vrot.lane.b32.xlu1 %v648_v58, %s1358_s4 }
 0x3c0   : > { %v1158_v61 = vpop.eup %1157 }
 0x3c1   : > { %v1642_v62 = vmul.f32 %v1158_v61, %v1152_v41 }
 0x3c3   : > { %v682_v63 = vmul.f32 %v680_v53, %v1642_v62  ;;  %v1020_v37 = vpack.c.bf16 %v1642_v62, %v1642_v62 }
 0x3c5   : > { %765 = vperm.xlu0 %1133, %v682_v63   ;;  %685 = vperm.xlu1 %1130, %v682_v63  }
 0x3c9   : > { %1131 = vset.pattern.permute.xlu1 %v1362_v2  ;;  %610 = vrot.lane.b32.xlu0 %v608_v1, %s1363_s17 }
 0x3ca   : > { %711 = vperm.xlu1 %1131, %v682_v63  }
 0x3ce   : > { %1132 = vset.pattern.permute.xlu1 %v1364_v3 }
 0x3cf   : > { %737 = vperm.xlu1 %1132, %v682_v63  }
 0x3d3   : > { %1134 = vset.pattern.permute.xlu1 %v1355_v13 }
 0x3d4   : > { %672 = vperm.xlu1 %1134, %v423_v34  }
 0x3d8   : > { %617 = vrot.lane.b32.xlu1 %v615_v42, %s1359_s13 }
 0x42b   : > { %v655_v8 = vpop.permute.xlu0 %654  ;;  %v653_v9 = vpop.permute.xlu1 %652 }
 0x42c   : > { %v656_v14 = vsel %vm556_vm2, %v653_v9, %v655_v8 }
 0x42d   : > { %v658_v21 = vadd.f32 %v656_v14, %v1628_v40 }
 0x440   : > { %v1650_v15 = vpop.permute.xlu0 %765  ;;  %v686_v16 = vpop.permute.xlu1 %685 }
 0x441   : > { %v688_v18 = vmul.f32 %v686_v16, %v1628_v40  ;;  %v1654_v19 = vmul.f32 %v1650_v15, %v669_v12  ;;  %v698_v22 = vmul.f32 %v686_v16, %v658_v21  ;;  %v704_v26 = vmul.f32 %v686_v16, %v668_v25 }
 0x442   : > { %v768_v34 = vmul.f32 %v1650_v15, %v1628_v40  ;;  %v776_v36 = vmul.f32 %v1650_v15, %v658_v21  ;;  %v774_v62 = vmul.f32 %v1650_v15, %v1619_v29 }
 0x443   : > { %690 = vrot.lane.b32.xlu1 %v688_v18, %s1357_s26  ;;  %694 = vrot.lane.b32.xlu0 %v688_v18, %s1365_s14 }
 0x444   : > { %v611_v39 = vpop.permute.xlu0 %610 }
 0x445   : > { %v712_v23 = vpop.permute.xlu1 %711  ;;  %v613_v55 = vadd.f32 %v611_v39, %v1628_v40 }
 0x446   : > { %v714_v24 = vmul.f32 %v712_v23, %v1628_v40  ;;  %v724_v28 = vmul.f32 %v712_v23, %v658_v21  ;;  %v730_v31 = vmul.f32 %v712_v23, %v668_v25 }
 0x447   : > { %700 = vrot.lane.b32.xlu1 %v698_v22, %s1357_s26 }
 0x448   : > { %716 = vrot.lane.b32.xlu0 %v714_v24, %s1366_s11 }
 0x44a   : > { %v738_v27 = vpop.permute.xlu1 %737 }
 0x44b   : > { %706 = vrot.lane.b32.xlu1 %v704_v26, %s1365_s14  ;;  %v740_v30 = vmul.f32 %v738_v27, %v1628_v40  ;;  %v746_v32 = vmul.f32 %v738_v27, %v1619_v29  ;;  %v752_v33 = vmul.f32 %v738_v27, %v658_v21  ;;  %v758_v35 = vmul.f32 %v738_v27, %v669_v12 }
 0x44c   : > { %720 = vrot.lane.b32.xlu0 %v714_v24, %s1367_s29 }
 0x44f   : > { %726 = vrot.lane.b32.xlu1 %v724_v28, %s1366_s11  ;;  %v673_v38 = vpop.permute.xlu1 %672 }
 0x450   : > { %742 = vrot.lane.b32.xlu0 %v740_v30, %s1358_s4  ;;  %v675_v50 = vmul.f32 %v673_v38, %v1628_v40  ;;  %v676_v60 = vmul.f32 %v673_v38, %v613_v55 }
 0x453   : > { %732 = vrot.lane.b32.xlu1 %v730_v31, %s1367_s29  ;;  %v618_v41 = vpop.permute.xlu1 %617 }
 0x454   : > { %748 = vrot.lane.b32.xlu0 %v746_v32, %s1359_s13  ;;  %v620_v46 = vsub.f32 %v614_v10, %v618_v41 }
 0x456   : > { %v622_v49 = vsub.f32 %v620_v46, %v621_v17 }
 0x457   : > { %754 = vrot.lane.b32.xlu1 %v752_v33, %s1358_s4  ;;  %s1271_s4 = sshll.u32 %s1370_s9, 4  ;;  %s1272_s4 = int_to_ptr.vmem [resolvable:$false] %s1271_s4 }
 0x458   : > { %770 = vrot.lane.b32.xlu0 %v768_v34, %s1365_s14  ;;  %v623_v54 = vmul.f32 -0.5, %v622_v49  ;;  %p1274_p1 = scmp.lt.s32.totalorder %s846_s18, %s1272_s4 }
 0x45a   : > { %v677_v0 = vmul.f32 %v673_v38, %v623_v54 }
 0x45b   : > { %760 = vrot.lane.b32.xlu1 %v758_v35, %s1359_s13  ;;  %s1273_s13 = scalar_lea.vmem %s1272_s4, 128 }
 0x45c   : > { %778 = vrot.lane.b32.xlu0 %v776_v36, %s1365_s14 }
 0x45f   : > { %788 = vrot.lane.b32.xlu1 %v1020_v37, %s1357_s26  ;;  %s1267_s26 = scalar_lea.vmem %s846_s18, 64 }
 0x460   : > { %p1268_p3 = scmp.ne.s32.totalorder %s846_s18, %s1267_s26  ;;  %p1275_p7 = scmp.lt.s32.totalorder %s1273_s13, %s1267_s26 }
 0x462   : > { %p1269_p13 = pnand %p1268_p3, %p1756_p9  ;;  %p1276_p4 = por %p1275_p7, %p1274_p1 }
 0x464   : > { %p1270_p5 = pneg %p1269_p13 }
 0x466   : > { %p1277_p10 = pnand %p1276_p4, %p1270_p5 }
 0x4b5   : > { %v691_v42 = vpop.permute.xlu1 %690  ;;  %v695_v43 = vpop.permute.xlu0 %694 }
 0x4b6   : > { %v697_v53 = vadd.f32 %v695_v43, %v675_v50  ;;  %v693_v56 = vadd.f32 %v691_v42, %v675_v50 }
 0x4b9   : > { %v701_v44 = vpop.permute.xlu1 %700 }
 0x4ba   : > { %v717_v45 = vpop.permute.xlu0 %716  ;;  %v703_v1 = vadd.f32 %v701_v44, %v676_v60 }
 0x4bb   : > { %v719_v61 = vadd.f32 %v717_v45, %v693_v56 }
 0x4bd   : > { %v707_v47 = vpop.permute.xlu1 %706 }
 0x4be   : > { %v721_v48 = vpop.permute.xlu0 %720  ;;  %v709_v5 = vadd.f32 %v707_v47, %v677_v0 }
 0x4bf   : > { %v723_v57 = vadd.f32 %v721_v48, %v697_v53 }
 0x4c1   : > { %v727_v51 = vpop.permute.xlu1 %726 }
 0x4c2   : > { %v743_v52 = vpop.permute.xlu0 %742  ;;  %v729_v7 = vadd.f32 %v727_v51, %v703_v1 }
 0x4c3   : > { %v745_v2 = vadd.f32 %v743_v52, %v719_v61 }
 0x4c5   : > { %v733_v58 = vpop.permute.xlu1 %732 }
 0x4c6   : > { %v749_v59 = vpop.permute.xlu0 %748  ;;  %v735_v9 = vadd.f32 %v733_v58, %v709_v5 }
 0x4c7   : > { %v751_v63 = vadd.f32 %v749_v59, %v723_v57 }
 0x4c9   : > { %v775_v3 = vadd.f32 %v774_v62, %v751_v63  ;;  %v755_v4 = vpop.permute.xlu1 %754 }
 0x4ca   : > { %v771_v6 = vpop.permute.xlu0 %770  ;;  %v757_v10 = vadd.f32 %v755_v4, %v729_v7 }
 0x4cb   : > { %v1022_v40 = vpack.c.bf16 %v775_v3, %v775_v3  ;;  %v773_v8 = vadd.f32 %v771_v6, %v745_v2 }
 0x4cd   : > { %v1021_v11 = vpack.c.bf16 %v773_v8, %v773_v8  ;;  %v761_v12 = vpop.permute.xlu1 %760  ;;  %806 = vrot.lane.b32.xlu1 %v1022_v40, %s1368_s16 }
 0x4ce   : > { %v763_v14 = vadd.f32 %v761_v12, %v735_v9  ;;  %v779_v29 = vpop.permute.xlu0 %778 }
 0x4cf   : > { %v781_v15 = vadd.f32 %v779_v29, %v757_v10  ;;  %797 = vrot.lane.b32.xlu0 %v1021_v11, %s1368_s16 }
 0x4d0   : > { %v783_v16 = vadd.f32 %v1654_v19, %v763_v14 }
 0x4d1   : > { %v1023_v17 = vpack.c.bf16 %v781_v15, %v781_v15  ;;  %v789_v18 = vpop.permute.xlu1 %788 }
 0x4d2   : > { %v1024_v20 = vpack.c.bf16 %v783_v16, %v783_v16  ;;  %792 = vst.msk [vmem:[%s412_s20] sm:$0xf] %vm791_vm5, %v789_v18 }
 0x4d3   : > { %815 = vrot.lane.b32.xlu0 %v1023_v17, %s1369_s22 }
 0x4d4   : > { %824 = vrot.lane.b32.xlu1 %v1024_v20, %s1369_s22 }
 0x53f   : > { %v807_v22 = vpop.permute.xlu1 %806 }
 0x541   : > { %v798_v21 = vpop.permute.xlu0 %797 }
 0x542   : > { %801 = vst.msk [vmem:[%s412_s20] sm:$0xf] %vm800_vm6, %v798_v21 }
 0x543   : > { %810 = vst.msk [vmem:[%s412_s20] sm:$0xf] %vm809_vm7, %v807_v22 }
 0x545   : > { %v816_v19 = vpop.permute.xlu0 %815 }
 0x546   : > { %819 = vst.msk [vmem:[%s412_s20] sm:$0xf] %vm818_vm8, %v816_v19  ;;  %v825_v23 = vpop.permute.xlu1 %824 }
 0x547   : > { %828 = vst.msk [vmem:[%s412_s20] sm:$0xf] %vm827_vm9, %v825_v23 }
 0x548   : > { %830 = vst.msk [vmem:[%s412_s20] sm:$0xf] %vm829_vm10, %v1355_v13 }
 0x549   : > { %1280 = shalt.err (!%p1277_p10)
}
 0x54a   : > { %s1281_s17 = scalar_lea.hbm %s1682_s23, 64  ;;  %s1285_s11 = scalar_lea.hbm %s1728_s8, 128 }
 0x54b   : > { %p1282_p0 = scmp.ne.s32.totalorder %s1682_s23, %s1281_s17  ;;  %p1286_p2 = scmp.lt.s32.totalorder %s1682_s23, %s1728_s8 }
 0x54c   : > { %p1287_p6 = scmp.lt.s32.totalorder %s1285_s11, %s1281_s17 }
 0x54d   : > { %p1283_p8 = pnand %p1282_p0, %p1756_p9 }
 0x54e   : > { %p1288_p12 = por %p1287_p6, %p1286_p2 }
 0x54f   : > { %p1284_p11 = pneg %p1283_p8 }
 0x551   : > { %p1289_p3 = pnand %p1288_p12, %p1284_p11 }
 0x553   : > { %1292 = shalt.err (!%p1289_p3)
}
 0x554   : > { %1048 = dma.vmem_to_hbm [thread:$0]  (%p1756_p9), %s846_s18, 64, %s1682_s23, %s832_s6  }
 0x555 PF: > { %s857_s16 = sand.u32 1, %s1331_s27   ;;  %p1757_p13 = scmp.ne.s32.totalorder %s1740_s12, 0 }
 0x556   : > { %p1758_p5 = scmp.ge.s32.totalorder %s1343_s30, 2  ;;  %s858_s20 = scalar_lea.sflag [#allocation4], %s857_s16 }
 0x558   : > { %p1065_p1 = pnand %p1758_p5, %p1757_p13 }
 0x55a   : > { %p1066_p7 = pneg %p1065_p1 }
 0x55c   : > { %1326 = dma.done.wait (%p1066_p7), %s858_s20, 64  }
 0x55d   : > { %1328 = vsyncadd (%p1066_p7), %s858_s20, 4294967232  ;;  %s1759_s30 = sld [smem:[#allocation17_spill]]  ;;  %s1762_s27 = smov %s1335_s28 }
 0x55e   : > { %s1760_s22 = sld [smem:[#allocation16_spill]] }
 0x55f   : > { %s1761_s29 = sld [smem:[#allocation18_spill]] }
 0x563   : > { %p25_p4 = scmp.ge.s32.totalorder %s1759_s30, 4  }
 0x564   : > { %s1763_s28 = smov %s1760_s22 }
 0x565   :  { %27 = sbr.rel (!%p25_p4) target bundleno = 11 (0xb), region = 124 }
 0x56a   :  { %863 = vsyncpa [#allocation3], 1 }
 0x56b   :  { %865 = vsyncpa [#allocation3 + $0x1], 1 }
 0x56c   :  { %866 = vsyncpa [#allocation6], 1 }
 0x56d   :  { %868 = vsyncpa [#allocation6 + $0x1], 1 }
 0x56e   :  { %869 = vsyncpa [#allocation9], 1 }
 0x56f   :  { %870 = vsyncpa [#allocation4], 1 }
 0x570   :  { %872 = vsyncpa [#allocation4 + $0x1], 1 }

</bundles_post_ra>
